<compile_context>
chip_gen: v7x
topology: tpu7x:2x2x1
jax: 0.10.0
libtpu: 0.0.40
codegen_flags: <defaults>
</compile_context>

<pallas_src>
import functools

import jax
import jax.numpy as jnp
from jax import lax
from jax.experimental import pallas as pl
from jax.experimental.pallas import tpu as pltpu


def _round_up(x, m):
    return (x + m - 1) // m * m


# ----------------------------------------------------------------------------
# Kernel: Tt recurrent steps per grid iteration, hidden carried in VMEM.
# Inputs are pre-activations (input matmul hoisted to the wrapper).
# ----------------------------------------------------------------------------
def _dsrrnn_recurrent_kernel(xpre_ref, h0_ref, whh_ref, h_all_ref, h_scr):
    tb = pl.program_id(1)

    @pl.when(tb == 0)
    def _():
        h_scr[...] = h0_ref[...]

    whh = whh_ref[...]                     # (hidden_pad, hidden_pad), resident
    tt = h_all_ref.shape[0]                # static time-block length

    def step(s, h):
        # h_new = tanh(xpre_t + h @ W_hh)   -- K = hidden_pad (128), lane-dense
        h_new = jnp.tanh(
            xpre_ref[s]
            + jnp.dot(h, whh, preferred_element_type=jnp.float32))
        h_all_ref[s] = h_new               # full-128-lane store
        return h_new

    # Short static trip count: unroll so the LLO scheduler sees all of it.
    h_scr[...] = lax.fori_loop(0, tt, step, h_scr[...], unroll=True)


# ----------------------------------------------------------------------------
# Wrappers
# ----------------------------------------------------------------------------
def pick_block_batch(n, max_block_batch=256):
    """Generation-aware batch block: split >=2 ways on v7x (2 TCs), else whole."""
    n8 = _round_up(max(n, 1), 8)
    kind = ""
    try:
        kind = jax.devices()[0].device_kind.lower()
    except Exception:
        pass
    if "v7" in kind and n8 >= 16:
        n8 = _round_up((n8 + 1) // 2, 8)   # >= 2 'parallel' blocks for megacore
    return min(n8, max_block_batch)


@functools.partial(jax.jit, static_argnames=("block_batch", "time_block"))
def dsrrnn_sequence(xs, h0, params, *, block_batch=None, time_block=8):
    """Run T RNN steps; the recurrent loop lives in ONE pallas_call.

    xs: (T, n, input_size) precomputed inputs, h0: (n, hidden).
    Returns (probs (T, n, output), h_final (n, hidden)).
    """
    T, n, _ = xs.shape
    hidden = h0.shape[1]

    xs = xs.astype(jnp.float32)
    h0 = h0.astype(jnp.float32)
    w_ih = params["w_ih"].astype(jnp.float32)
    w_hh = params["w_hh"].astype(jnp.float32)
    b_h = (params["b_ih"] + params["b_hh"]).astype(jnp.float32)
    w_proj = params["w_proj"].astype(jnp.float32)
    b_proj = params["b_proj"].astype(jnp.float32)

    # Hoisted, non-recurrent part: one big (T*n, in) x (in, hidden) matmul.
    xpre = xs @ w_ih + b_h                           # (T, n, hidden)

    # Padding: hidden -> 128 lanes, batch -> block multiple, T -> Tt multiple.
    hidden_pad = _round_up(hidden, 128)
    bb = block_batch if block_batch is not None else min(_round_up(n, 8), 256)
    n_pad = _round_up(n, bb)
    tt = min(time_block, T)
    t_pad = _round_up(T, tt)

    xpre = jnp.pad(xpre, ((0, t_pad - T), (0, n_pad - n),
                          (0, hidden_pad - hidden)))
    h0p = jnp.pad(h0, ((0, n_pad - n), (0, hidden_pad - hidden)))
    whh = jnp.pad(w_hh, ((0, hidden_pad - hidden), (0, hidden_pad - hidden)))

    grid = (n_pad // bb, t_pad // tt)

    h_all = pl.pallas_call(
        _dsrrnn_recurrent_kernel,
        grid_spec=pltpu.PrefetchScalarGridSpec(
            num_scalar_prefetch=0,
            grid=grid,
            in_specs=[
                pl.BlockSpec((tt, bb, hidden_pad), lambda b, t: (t, b, 0)),   # xpre
                pl.BlockSpec((bb, hidden_pad), lambda b, t: (b, 0)),          # h0
                pl.BlockSpec((hidden_pad, hidden_pad), lambda b, t: (0, 0)),  # W_hh
            ],
            out_specs=pl.BlockSpec((tt, bb, hidden_pad), lambda b, t: (t, b, 0)),
            scratch_shapes=[pltpu.VMEM((bb, hidden_pad), jnp.float32)],
        ),
        out_shape=jax.ShapeDtypeStruct((t_pad, n_pad, hidden_pad), jnp.float32),
        compiler_params=pltpu.CompilerParams(
            dimension_semantics=("parallel", "arbitrary")),
    )(xpre, h0p, whh)

    h_seq = h_all[:T, :n, :hidden]                   # (T, n, hidden)

    # Projection + softmax once over all steps (one big MXU-efficient matmul).
    logits = h_seq @ w_proj + b_proj
    probs = jax.nn.softmax(logits, axis=-1)
    return probs, h_seq[T - 1]


def dsrrnn_forward(x, h, params, **kw):
    """Single step, matching DSRRNN.forward for type='rnn': (probs, h_new)."""
    probs, h_new = dsrrnn_sequence(x[None], h, params, **kw)
    return probs[0], h_new


# ----------------------------------------------------------------------------
# Parameter init + pure-JAX references
# ----------------------------------------------------------------------------
def init_params(key, input_size, hidden_size, output_size):
    """Deterministic init mimicking torch defaults (uniform(-1/sqrt(H), 1/sqrt(H)))."""
    ks = jax.random.split(key, 6)
    bnd = 1.0 / jnp.sqrt(hidden_size)
    u = lambda k, shape: jax.random.uniform(k, shape, jnp.float32, -bnd, bnd)
    return {
        # stored transposed: (in_features, out_features)
        "w_ih": u(ks[0], (input_size, hidden_size)),
        "b_ih": u(ks[1], (1, hidden_size)),
        "w_hh": u(ks[2], (hidden_size, hidden_size)),
        "b_hh": u(ks[3], (1, hidden_size)),
        "w_proj": u(ks[4], (hidden_size, output_size)),
        "b_proj": u(ks[5], (1, output_size)),
    }


def reference_step(x, h, p):
    pre = x @ p["w_ih"] + p["b_ih"] + h @ p["w_hh"] + p["b_hh"]
    h_new = jnp.tanh(pre)
    logits = h_new @ p["w_proj"] + p["b_proj"]
    return jax.nn.softmax(logits, axis=1), h_new


def reference_sequence(xs, h0, p):
    def step(h, x):
        out, h_new = reference_step(x, h, p)
        return h_new, out
    hT, outs = jax.lax.scan(step, h0, xs)
    return outs, hT


# ----------------------------------------------------------------------------
if __name__ == "__main__":
    key = jax.random.PRNGKey(0)

    # Small shapes implied by the module:
    #   input_size = n_parent_inputs + n_sibling_inputs, output_size = len(operators)
    n_parent, n_sibling = 10, 10
    input_size = n_parent + n_sibling          # 20
    hidden_size = 32
    output_size = 12
    batch = 10                                  # exercises batch padding (->16)
    T = 10                                      # exercises time padding (Tt=8)

    k_param, k_par, k_sib, k_hid = jax.random.split(key, 4)
    params = init_params(k_param, input_size, hidden_size, output_size)

    # Build T RNN inputs the way get_tensor_input does: one-hot(parent) || one-hot(sibling)
    kp = jax.random.split(k_par, T)
    ks = jax.random.split(k_sib, T)
    xs = jnp.stack([
        jnp.concatenate(
            [jax.nn.one_hot(jax.random.randint(kp[t], (batch,), 0, n_parent),
                            n_parent, dtype=jnp.float32),
             jax.nn.one_hot(jax.random.randint(ks[t], (batch,), 0, n_sibling),
                            n_sibling, dtype=jnp.float32)],
            axis=1)
        for t in range(T)
    ])

    # init_hidden (num_layers=1, hidden_size) repeated over batch
    init_hidden = jax.random.uniform(k_hid, (1, hidden_size), jnp.float32)
    h0 = jnp.tile(init_hidden, (batch, 1))

    bb = pick_block_batch(batch)

    # --- single step (== DSRRNN.forward for type='rnn') ---
    out1, h1 = dsrrnn_forward(xs[0], h0, params, block_batch=bb)
    jax.block_until_ready((out1, h1))
    out1_ref, h1_ref = reference_step(xs[0], h0, params)
    assert jnp.allclose(out1, out1_ref, atol=1e-5, rtol=1e-5)
    assert jnp.allclose(h1, h1_ref, atol=1e-5, rtol=1e-5)

    # --- T steps with the recurrent loop in ONE pallas_call ---
    outs, hT = dsrrnn_sequence(xs, h0, params, block_batch=bb, time_block=8)
    jax.block_until_ready((outs, hT))
    outs_ref, hT_ref = reference_sequence(xs, h0, params)
    assert jnp.allclose(outs, outs_ref, atol=1e-5, rtol=1e-5)
    assert jnp.allclose(hT, hT_ref, atol=1e-5, rtol=1e-5)
    assert jnp.allclose(jnp.sum(outs, axis=-1), 1.0, atol=1e-5)

    # TODO(synk): sample_n_expressions / apply_constraints / get_next_obs are
    # host-side autoregressive sampling with data-dependent numpy priors; only
    # the RNN hot path (recurrent cell + projection + softmax) is expressed
    # here, with the recurrent part as a Pallas kernel.
    print("KERNEL_OK")
</pallas_src>

<mosaic_0001>
module attributes {stable_mosaic.version = 11 : i64} {
  func.func @_dsrrnn_recurrent_kernel(%arg0: i32, %arg1: i32, %arg2: memref<1x16x128xf32, #tpu.memory_space<vmem>>, %arg3: memref<16x128xf32, #tpu.memory_space<vmem>>, %arg4: memref<128x128xf32, #tpu.memory_space<vmem>>, %arg5: memref<1x16x128xf32, #tpu.memory_space<vmem>>, %arg6: memref<16x128xf32, #tpu.memory_space<vmem>>) attributes {dimension_semantics = [#tpu.dimension_semantics<parallel>, #tpu.dimension_semantics<arbitrary>], iteration_bounds = array<i64: 1, 1>, scalar_prefetch = 0 : i64, scratch_operands = 1 : i64, tpu.core_type = #tpu.core_type<tc>, window_params = [{transform_indices = @transform_0, window_bounds = array<i64: 1, 16, 128>}, {transform_indices = @transform_1, window_bounds = array<i64: 16, 128>}, {pipeline_mode = #tpu.pipeline_mode<synchronous>, transform_indices = @transform_2, window_bounds = array<i64: 128, 128>}, {transform_indices = @transform_3, window_bounds = array<i64: 1, 16, 128>}]} {
    %c0_i32 = arith.constant 0 : i32
    %0 = arith.cmpi eq, %arg1, %c0_i32 : i32
    %1 = arith.extui %0 : i1 to i32
    %c0_i32_0 = arith.constant 0 : i32
    %2 = arith.cmpi ne, %1, %c0_i32_0 : i32
    scf.if %2 {
      %c0_11 = arith.constant 0 : index
      %c0_12 = arith.constant 0 : index
      %16 = vector.load %arg3[%c0_11, %c0_12] : memref<16x128xf32, #tpu.memory_space<vmem>>, vector<16x128xf32>
      %c0_13 = arith.constant 0 : index
      %c0_14 = arith.constant 0 : index
      %17 = vector.load %arg6[%c0_13, %c0_14] : memref<16x128xf32, #tpu.memory_space<vmem>>, vector<16x128xf32>
      tpu.vector_store %arg6[%c0_13, %c0_14], %16 {strides = array<i32>} : memref<16x128xf32, #tpu.memory_space<vmem>>, vector<16x128xf32>,
    } else {
    }
    %c0 = arith.constant 0 : index
    %c0_1 = arith.constant 0 : index
    %3 = vector.load %arg4[%c0, %c0_1] : memref<128x128xf32, #tpu.memory_space<vmem>>, vector<128x128xf32>
    %c0_2 = arith.constant 0 : index
    %c0_3 = arith.constant 0 : index
    %4 = vector.load %arg6[%c0_2, %c0_3] : memref<16x128xf32, #tpu.memory_space<vmem>>, vector<16x128xf32>
    %c0_i32_4 = arith.constant 0 : i32
    %5 = arith.index_cast %c0_i32_4 : i32 to index
    %c0_5 = arith.constant 0 : index
    %c0_6 = arith.constant 0 : index
    %6 = vector.load %arg2[%5, %c0_5, %c0_6] : memref<1x16x128xf32, #tpu.memory_space<vmem>>, vector<1x16x128xf32>
    %7 = vector.shape_cast %6 : vector<1x16x128xf32> to vector<16x128xf32>
    %cst = arith.constant dense<0.000000e+00> : vector<16x128xf32>
    %8 = tpu.matmul %4, %3, %cst {dimension_numbers = #tpu.dot_dimension_numbers<[1], [0], [0], [1], [0, 0, 1, 1], [], []>} : vector<16x128xf32>, vector<128x128xf32>, vector<16x128xf32> -> vector<16x128xf32>
    %9 = arith.addf %7, %8 : vector<16x128xf32>
    %10 = math.tanh %9 : vector<16x128xf32>
    %11 = arith.index_cast %c0_i32_4 : i32 to index
    %c0_7 = arith.constant 0 : index
    %c0_8 = arith.constant 0 : index
    %12 = vector.load %arg5[%11, %c0_7, %c0_8] : memref<1x16x128xf32, #tpu.memory_space<vmem>>, vector<1x16x128xf32>
    %13 = vector.shape_cast %12 : vector<1x16x128xf32> to vector<16x128xf32>
    %14 = vector.shape_cast %10 : vector<16x128xf32> to vector<1x16x128xf32>
    tpu.vector_store %arg5[%11, %c0_7, %c0_8], %14 {strides = array<i32>} : memref<1x16x128xf32, #tpu.memory_space<vmem>>, vector<1x16x128xf32>,
    %c1_i32 = arith.constant 1 : i32
    %c0_9 = arith.constant 0 : index
    %c0_10 = arith.constant 0 : index
    %15 = vector.load %arg6[%c0_9, %c0_10] : memref<16x128xf32, #tpu.memory_space<vmem>>, vector<16x128xf32>
    tpu.vector_store %arg6[%c0_9, %c0_10], %10 {strides = array<i32>} : memref<16x128xf32, #tpu.memory_space<vmem>>, vector<16x128xf32>,
    return
  }
  func.func @transform_0(%arg0: i32, %arg1: i32) -> (i32, i32, i32) {
    %c0_i32 = arith.constant 0 : i32
    %c0_i32_0 = arith.constant 0 : i32
    return %arg1, %arg0, %c0_i32 : i32, i32, i32
  }
  func.func @transform_1(%arg0: i32, %arg1: i32) -> (i32, i32) {
    %c0_i32 = arith.constant 0 : i32
    %c0_i32_0 = arith.constant 0 : i32
    return %arg0, %c0_i32 : i32, i32
  }
  func.func @transform_2(%arg0: i32, %arg1: i32) -> (i32, i32) {
    %c0_i32 = arith.constant 0 : i32
    %c0_i32_0 = arith.constant 0 : i32
    %c0_i32_1 = arith.constant 0 : i32
    return %c0_i32, %c0_i32_0 : i32, i32
  }
  func.func @transform_3(%arg0: i32, %arg1: i32) -> (i32, i32, i32) {
    %c0_i32 = arith.constant 0 : i32
    %c0_i32_0 = arith.constant 0 : i32
    return %arg1, %arg0, %c0_i32 : i32, i32, i32
  }
}

</mosaic_0001>

<bundles_post_ra>
// kernel: dsrrnn_sequence.1
= control target key start
LH: loop header
LB: loop body
LE: loop exit
PB: predicated region body
PF: predicated region fallthrough
CT: control target
= control target key end

     0   :  { %s304_s2 = inlined_call_operand.vmem [shape: f32[128,128], index: 2, kind: input, shape index: {}]   ;;  %s305_s1 = inlined_call_operand.vmem [shape: f32[16,128], index: 1, kind: input, shape index: {}]   ;;  %s306_s0 = inlined_call_operand.vmem [shape: f32[1,16,128], index: 0, kind: input, shape index: {}]   ;;  %s307_s3 = inlined_call_operand.vmem [shape: f32[1,16,128], index: 3, kind: output, shape index: {}]  }
   0x1   :  { %v22_v0 = vld [vmem:[%s304_s2] sm:$0xff]  ;;  %v23_v1 = vld [vmem:[%s304_s2 + $0x8] sm:$0xff]  ;;  %v24_v2 = vld [vmem:[%s304_s2 + $0x10] sm:$0xff] }
   0x2   :  { %v182_v3 = vpack.c.bf16 %v23_v1, %v22_v0  ;;  %v25_v4 = vld [vmem:[%s304_s2 + $0x18] sm:$0xff]  ;;  %v26_v6 = vld [vmem:[%s304_s2 + $0x20] sm:$0xff]  ;;  %v27_v7 = vld [vmem:[%s304_s2 + $0x28] sm:$0xff] }
   0x3   :  { %v186_v5 = vpack.c.bf16 %v25_v4, %v24_v2  ;;  %v190_v8 = vpack.c.bf16 %v27_v7, %v26_v6  ;;  %v18_v9 = vld [vmem:[%s305_s1] sm:$0xff]  ;;  %v28_v10 = vld [vmem:[%s304_s2 + $0x30] sm:$0xff]  ;;  %v29_v11 = vld [vmem:[%s304_s2 + $0x38] sm:$0xff] }
   0x4   :  { %183 = vmatprep.subr.bf16.mxu0 %v182_v3  ;;  %179 = vmatprep.mubr.f32.mxu0 %v18_v9  ;;  %v194_v12 = vpack.c.bf16 %v29_v11, %v28_v10  ;;  %v30_v13 = vld [vmem:[%s304_s2 + $0x40] sm:$0xff]  ;;  %v31_v14 = vld [vmem:[%s304_s2 + $0x48] sm:$0xff]  ;;  %v32_v16 = vld [vmem:[%s304_s2 + $0x50] sm:$0xff] }
   0x5   :  { %185 = vmatpush3.bf16.msra.mxu0 %v182_v3  ;;  %v198_v15 = vpack.c.bf16 %v31_v14, %v30_v13  ;;  %v33_v17 = vld [vmem:[%s304_s2 + $0x58] sm:$0xff]  ;;  %v34_v19 = vld [vmem:[%s304_s2 + $0x60] sm:$0xff]  ;;  %v35_v20 = vld [vmem:[%s304_s2 + $0x68] sm:$0xff] }
   0x6   :  { %187 = vmatprep.subr.bf16.mxu0 %v186_v5  ;;  %v202_v18 = vpack.c.bf16 %v33_v17, %v32_v16  ;;  %v206_v21 = vpack.c.bf16 %v35_v20, %v34_v19  ;;  %v36_v22 = vld [vmem:[%s304_s2 + $0x70] sm:$0xff]  ;;  %v37_v23 = vld [vmem:[%s304_s2 + $0x78] sm:$0xff]  ;;  %v19_v25 = vld [vmem:[%s305_s1 + $0x8] sm:$0xff] }
   0x7   :  { %v210_v24 = vpack.c.bf16 %v37_v23, %v36_v22  ;;  %v41_v26 = vld [vmem:[%s306_s0 + $0x8] sm:$0xff]  ;;  %v40_v27 = vld [vmem:[%s306_s0] sm:$0xff] }
   0x9   :  { %189 = vmatpush3.bf16.msra.mxu0 %v186_v5 }
   0xa   :  { %191 = vmatprep.subr.bf16.mxu0 %v190_v8 }
   0xd   :  { %193 = vmatpush3.bf16.msra.mxu0 %v190_v8 }
   0xe   :  { %195 = vmatprep.subr.bf16.mxu0 %v194_v12 }
  0x11   :  { %197 = vmatpush3.bf16.msra.mxu0 %v194_v12 }
  0x12   :  { %199 = vmatprep.subr.bf16.mxu0 %v198_v15 }
  0x15   :  { %201 = vmatpush3.bf16.msra.mxu0 %v198_v15 }
  0x16   :  { %203 = vmatprep.subr.bf16.mxu0 %v202_v18 }
  0x19   :  { %205 = vmatpush3.bf16.msra.mxu0 %v202_v18 }
  0x1a   :  { %207 = vmatprep.subr.bf16.mxu0 %v206_v21 }
  0x1d   :  { %209 = vmatpush3.bf16.msra.mxu0 %v206_v21 }
  0x1e   :  { %211 = vmatprep.subr.bf16.mxu0 %v210_v24 }
  0x21   :  { %213 = vmatpush3.bf16.msra.mxu0 %v210_v24 }
  0x24   :  { %180 = vmatmul.mubr.f32.vlgmr.msra.gmra.mrb[0].mxu0 %v19_v25 }
  0xf7   :  { %v181_v28 = vpop.f32.mrb[0].mxu0 }
  0xf8   :  { %v118_v29 = vadd.f32 %v181_v28, %v41_v26  ;;  %v108_v30 = vpop.f32.mrb[1].mxu0 }
  0xf9   :  { %v117_v31 = vadd.f32 %v108_v30, %v40_v27 }
  0xfa   :  { %214 = vtanh.f32 %v118_v29 }
  0xfb   :  { %216 = vtanh.f32 %v117_v31 }
 0x104   :  { %v215_v32 = vpop.eup %214 }
 0x105   :  { %v217_v33 = vpop.eup %216  ;;  %122 = vst [vmem:[%s307_s3 + $0x8] sm:$0xff] %v215_v32 }
 0x106   :  { %121 = vst [vmem:[%s307_s3] sm:$0xff] %v217_v33 }

</bundles_post_ra>
